<compile_context>
chip_gen: v7x
topology: tpu7x:2x2x1
jax: 0.10.0
libtpu: 0.0.40
codegen_flags: <defaults>
</compile_context>

<pallas_src>
import functools

import numpy as np
import jax
import jax.numpy as jnp
from jax.experimental import pallas as pl
from jax.experimental.pallas import tpu as pltpu


def _state_machine_kernel(state_ref, x_ref, w_ref, aux_ref, o_ref, *,
                          inv_bg, strength):
    # state_ref: (1,) f32 in SMEM
    # x_ref:     (B, D) f32      w_ref: (D, P) bf16
    # aux_ref:   (2, P) f32      row 0 = fused bias, row 1 = 0/1 gate mask
    # o_ref:     (B, P) f32      lanes [0,K): base head, [K,K+G): gate head
    x_bf = x_ref[...].astype(jnp.bfloat16)          # in-kernel cast (1 VPU pass)
    y = jnp.dot(x_bf, w_ref[...], preferred_element_type=jnp.float32)
    y = y + aux_ref[0:1, :]                          # broadcast bias row

    # target = mean(sigmoid(gate * 1000)) over the (B, G) gate block:
    # full-vreg sigmoid (EUP), constant-mask multiply (VPU), reduce (XLU),
    # compile-time reciprocal (no runtime divide).
    sig = jax.nn.sigmoid(y * 1000.0)
    gate_sum = jnp.sum(sig * aux_ref[1:2, :])
    target = gate_sum * inv_bg

    state = state_ref[0]
    scale = 1.0 + target - state
    if strength == 1.0:                       # static python check: skip pow
        pass
    elif float(strength).is_integer():        # repeated multiplies, no NaN
        scale = jax.lax.integer_pow(scale, int(strength))
    else:
        scale = scale ** strength             # mirrors PyTorch (NaN if base<0)

    # Scale the whole lane-dense 128-wide tile (unmasked vst). Gate/padding
    # lanes are discarded by the consumer.
    o_ref[...] = (y * scale).astype(o_ref.dtype)


def prepare_state_machine_params(w_base, b_base, w_gate, b_gate):
    """One-time, host-side parameter fusion (NOT on the per-call hot path).

    Fuses the base and gate heads (shared LHS x) into a single lane-padded
    bf16 weight, and packs bias + 0/1 gate mask into one (2, P) f32 aux array.
    """
    w_base = np.asarray(w_base, np.float32)
    w_gate = np.asarray(w_gate, np.float32)
    b_base = np.asarray(b_base, np.float32).reshape(-1)
    b_gate = np.asarray(b_gate, np.float32).reshape(-1)
    D, K = w_base.shape
    G = w_gate.shape[1]
    P = max(128, ((K + G + 127) // 128) * 128)       # lane-dense padded width

    w_fused = np.zeros((D, P), np.float32)
    w_fused[:, :K] = w_base
    w_fused[:, K:K + G] = w_gate

    aux = np.zeros((2, P), np.float32)
    aux[0, :K] = b_base
    aux[0, K:K + G] = b_gate
    aux[1, K:K + G] = 1.0                            # compile-time gate mask

    # bf16 weight: full-rate MXU on v6e/v7x, half the weight DMA bytes; the
    # dot still accumulates in f32 via preferred_element_type.
    w_bf = jnp.asarray(w_fused, dtype=jnp.bfloat16)
    aux = jnp.asarray(aux)
    return w_bf, aux, K, G, P


def make_state_machine_forward(w_base, b_base, w_gate, b_gate, strength=1.0):
    """Builds the jitted hot-path forward. Params are fused/cast exactly once."""
    w_bf, aux, K, G, P = prepare_state_machine_params(w_base, b_base,
                                                      w_gate, b_gate)
    D = w_bf.shape[0]
    strength = float(strength)

    @jax.jit
    def forward(x_nchw, state):
        B = x_nchw.shape[0]
        x_flat = x_nchw.reshape(B, -1).astype(jnp.float32)

        kernel = functools.partial(_state_machine_kernel,
                                   inv_bg=1.0 / float(B * G),
                                   strength=strength)
        cost = pl.CostEstimate(
            flops=2 * B * D * P + 8 * B * P,
            transcendentals=B * P,                       # sigmoid per element
            bytes_accessed=(B * D * 4 + D * P * 2 + 2 * P * 4 + B * P * 4),
        )
        out_padded = pl.pallas_call(
            kernel,
            out_shape=jax.ShapeDtypeStruct((B, P), jnp.float32),
            grid=(1,),
            in_specs=[
                pl.BlockSpec(memory_space=pltpu.MemorySpace.SMEM),  # state (1,)
                pl.BlockSpec((B, D), lambda i: (0, 0)),   # x            (f32)
                pl.BlockSpec((D, P), lambda i: (0, 0)),   # fused weight (bf16)
                pl.BlockSpec((2, P), lambda i: (0, 0)),   # bias + gate mask
            ],
            out_specs=pl.BlockSpec((B, P), lambda i: (0, 0)),
            compiler_params=pltpu.CompilerParams(
                dimension_semantics=("arbitrary",)),
            cost_estimate=cost,
        )(state, x_flat, w_bf, aux)
        # Returns the padded lane-dense (B, P) slab; real base logits are
        # columns [:, :K] — slice lazily in the consumer to avoid an extra
        # per-call dispatch in the hot path.
        return out_padded

    return forward, K, P


def state_machine_reference(x_nchw, w_base, b_base, w_gate, b_gate, state,
                            strength=1.0, quantize_bf16=False):
    """Pure-JAX reference (f32). With quantize_bf16=True it applies the same
    bf16 operand quantization as the kernel so the comparison is tight."""
    B = x_nchw.shape[0]
    x = x_nchw.reshape(B, -1).astype(jnp.float32)
    wb, wg = w_base, w_gate
    if quantize_bf16:
        x = x.astype(jnp.bfloat16).astype(jnp.float32)
        wb = wb.astype(jnp.bfloat16).astype(jnp.float32)
        wg = wg.astype(jnp.bfloat16).astype(jnp.float32)
    y_hat = x @ wb + b_base                      # detach: forward no-op
    gate = x @ wg + b_gate
    target = jnp.mean(jax.nn.sigmoid(gate * 1000.0))
    return y_hat * (1.0 + target - state[0]) ** strength


if __name__ == "__main__":
    # MNIST-like small shapes: batch=8, 1x16x16 images, 10 classes, 32 gates.
    B, C, H, W = 8, 1, 16, 16
    D = C * H * W
    K = 10          # base-network output classes
    G = 32          # flip_network output width
    STRENGTH = 1.0

    key = jax.random.PRNGKey(0)
    kx, kwb, kbb, kwg, kbg = jax.random.split(key, 5)

    x = jax.random.normal(kx, (B, C, H, W), dtype=jnp.float32)

    # deterministic synthetic parameters (PyTorch-linear-style 1/sqrt(fan_in))
    # TODO(synk): `base` and `flip_network` are undefined in the PyTorch
    # snippet; they are realized here as single linear heads.
    s = 1.0 / jnp.sqrt(jnp.float32(D))
    w_base = jax.random.uniform(kwb, (D, K), jnp.float32, -s, s)
    b_base = jax.random.uniform(kbb, (1, K), jnp.float32, -s, s)
    w_gate = jax.random.uniform(kwg, (D, G), jnp.float32, -s, s)
    b_gate = jax.random.uniform(kbg, (1, G), jnp.float32, -s, s)
    state = jnp.zeros((1,), jnp.float32)      # nn.Parameter(torch.zeros(()))

    forward, K_out, P = make_state_machine_forward(
        w_base, b_base, w_gate, b_gate, strength=STRENGTH)

    out_padded = jax.block_until_ready(forward(x, state))
    assert out_padded.shape == (B, P)
    out = out_padded[:, :K_out]               # consumer-side slice (test only)
    assert out.shape == (B, K)

    # Tight check against a reference using the kernel's bf16 operand
    # quantization (same math path, f32 accumulation).
    ref_q = state_machine_reference(x, w_base, b_base, w_gate, b_gate, state,
                                    strength=STRENGTH, quantize_bf16=True)
    assert jnp.allclose(out, ref_q, atol=5e-3, rtol=5e-3), "bf16-path mismatch"

    # Looser check against the pure-f32 module semantics (bf16 operand
    # quantization of a D=256 matmul stays well within this band; note the
    # hard sigmoid(1000*gate) can shift `target` by 1/(B*G) quanta if a gate
    # pre-activation flips sign under bf16 — keep the gate head in f32 if
    # exact parity with the f32 PyTorch module is required).
    ref = state_machine_reference(x, w_base, b_base, w_gate, b_gate, state,
                                  strength=STRENGTH)
    assert jnp.allclose(out, ref, atol=3e-2, rtol=3e-2), "f32-reference mismatch"

    print("KERNEL_OK")
</pallas_src>

<mosaic_0001>
module attributes {stable_mosaic.version = 11 : i64} {
  func.func @_state_machine_kernel(%arg0: i32, %arg1: memref<1xf32, #tpu.memory_space<smem>>, %arg2: memref<8x256xf32, #tpu.memory_space<vmem>>, %arg3: memref<256x128xbf16, #tpu.memory_space<vmem>>, %arg4: memref<2x128xf32, #tpu.memory_space<vmem>>, %arg5: memref<8x128xf32, #tpu.memory_space<vmem>>) attributes {dimension_semantics = [#tpu.dimension_semantics<arbitrary>], iteration_bounds = array<i64: 1>, scalar_prefetch = 0 : i64, scratch_operands = 0 : i64, tpu.core_type = #tpu.core_type<tc>, window_params = [{transform_indices = @transform_0, window_bounds = array<i64: 1>}, {pipeline_mode = #tpu.pipeline_mode<synchronous>, transform_indices = @transform_1, window_bounds = array<i64: 8, 256>}, {pipeline_mode = #tpu.pipeline_mode<synchronous>, transform_indices = @transform_2, window_bounds = array<i64: 256, 128>}, {pipeline_mode = #tpu.pipeline_mode<synchronous>, transform_indices = @transform_3, window_bounds = array<i64: 2, 128>}, {pipeline_mode = #tpu.pipeline_mode<synchronous>, transform_indices = @transform_4, window_bounds = array<i64: 8, 128>}]} {
    %c0 = arith.constant 0 : index
    %c0_0 = arith.constant 0 : index
    %0 = vector.load %arg2[%c0, %c0_0] : memref<8x256xf32, #tpu.memory_space<vmem>>, vector<8x256xf32>
    %1 = arith.truncf %0 : vector<8x256xf32> to vector<8x256xbf16>
    %c0_1 = arith.constant 0 : index
    %c0_2 = arith.constant 0 : index
    %2 = vector.load %arg3[%c0_1, %c0_2] : memref<256x128xbf16, #tpu.memory_space<vmem>>, vector<256x128xbf16>
    %cst = arith.constant dense<0.000000e+00> : vector<8x128xf32>
    %3 = tpu.matmul %1, %2, %cst {dimension_numbers = #tpu.dot_dimension_numbers<[1], [0], [0], [1], [0, 0, 1, 1], [], []>} : vector<8x256xbf16>, vector<256x128xbf16>, vector<8x128xf32> -> vector<8x128xf32>
    %c0_3 = arith.constant 0 : index
    %c0_4 = arith.constant 0 : index
    %4 = vector.load %arg4[%c0_3, %c0_4] : memref<2x128xf32, #tpu.memory_space<vmem>>, vector<1x128xf32>
    %5 = vector.broadcast %4 : vector<1x128xf32> to vector<8x128xf32>
    %6 = arith.addf %3, %5 : vector<8x128xf32>
    %cst_5 = arith.constant 1.000000e+03 : f32
    %7 = vector.broadcast %cst_5 : f32 to vector<8x128xf32>
    %8 = arith.mulf %6, %7 : vector<8x128xf32>
    %9 = arith.negf %8 : vector<8x128xf32>
    %10 = math.exp %9 : vector<8x128xf32>
    %cst_6 = arith.constant 1.000000e+00 : f32
    %11 = vector.broadcast %cst_6 : f32 to vector<8x128xf32>
    %12 = arith.addf %11, %10 : vector<8x128xf32>
    %13 = arith.divf %11, %12 : vector<8x128xf32>
    %c1 = arith.constant 1 : index
    %c0_7 = arith.constant 0 : index
    %14 = vector.load %arg4[%c1, %c0_7] : memref<2x128xf32, #tpu.memory_space<vmem>>, vector<1x128xf32>
    %15 = vector.broadcast %14 : vector<1x128xf32> to vector<8x128xf32>
    %16 = arith.mulf %13, %15 : vector<8x128xf32>
    %17 = vector.shape_cast %16 : vector<8x128xf32> to vector<1x8x128xf32>
    %cst_8 = arith.constant dense<0.000000e+00> : vector<1xf32>
    %18 = vector.multi_reduction <add>, %17, %cst_8 [1, 2] : vector<1x8x128xf32> to vector<1xf32>
    %19 = vector.shape_cast %18 : vector<1xf32> to vector<1x1x1xf32>
    %20 = vector.extract %19[0, 0, 0] : f32 from vector<1x1x1xf32>
    %cst_9 = arith.constant 3.906250e-03 : f32
    %21 = arith.mulf %20, %cst_9 : f32
    %c0_10 = arith.constant 0 : index
    %22 = memref.load %arg1[%c0_10] : memref<1xf32, #tpu.memory_space<smem>>
    %cst_11 = arith.constant 1.000000e+00 : f32
    %23 = arith.addf %cst_11, %21 : f32
    %24 = arith.subf %23, %22 : f32
    %25 = vector.broadcast %24 : f32 to vector<8x128xf32>
    %26 = arith.mulf %6, %25 : vector<8x128xf32>
    %c0_12 = arith.constant 0 : index
    %c0_13 = arith.constant 0 : index
    %27 = vector.load %arg5[%c0_12, %c0_13] : memref<8x128xf32, #tpu.memory_space<vmem>>, vector<8x128xf32>
    tpu.vector_store %arg5[%c0_12, %c0_13], %26 {strides = array<i32>} : memref<8x128xf32, #tpu.memory_space<vmem>>, vector<8x128xf32>,
    return
  }
  func.func @transform_0(%arg0: i32) -> i32 {
    %c0_i32 = arith.constant 0 : i32
    %c0_i32_0 = arith.constant 0 : i32
    return %c0_i32 : i32
  }
  func.func @transform_1(%arg0: i32) -> (i32, i32) {
    %c0_i32 = arith.constant 0 : i32
    %c0_i32_0 = arith.constant 0 : i32
    %c0_i32_1 = arith.constant 0 : i32
    return %c0_i32, %c0_i32_0 : i32, i32
  }
  func.func @transform_2(%arg0: i32) -> (i32, i32) {
    %c0_i32 = arith.constant 0 : i32
    %c0_i32_0 = arith.constant 0 : i32
    %c0_i32_1 = arith.constant 0 : i32
    return %c0_i32, %c0_i32_0 : i32, i32
  }
  func.func @transform_3(%arg0: i32) -> (i32, i32) {
    %c0_i32 = arith.constant 0 : i32
    %c0_i32_0 = arith.constant 0 : i32
    %c0_i32_1 = arith.constant 0 : i32
    return %c0_i32, %c0_i32_0 : i32, i32
  }
  func.func @transform_4(%arg0: i32) -> (i32, i32) {
    %c0_i32 = arith.constant 0 : i32
    %c0_i32_0 = arith.constant 0 : i32
    %c0_i32_1 = arith.constant 0 : i32
    return %c0_i32, %c0_i32_0 : i32, i32
  }
}

</mosaic_0001>

<bundles_post_ra>
// kernel: forward.1
= control target key start
LH: loop header
LB: loop body
LE: loop exit
PB: predicated region body
PF: predicated region fallthrough
CT: control target
= control target key end

     0   :  { %s429_s0 = inlined_call_operand.<no memory space> [shape: f32[1], index: 0, kind: input, shape index: {}]   ;;  %s430_s1 = inlined_call_operand.vmem [shape: f32[8,256], index: 1, kind: input, shape index: {}]   ;;  %s431_s2 = inlined_call_operand.vmem [shape: bf16[256,128], index: 2, kind: input, shape index: {}]   ;;  %s432_s3 = inlined_call_operand.vmem [shape: f32[2,128], index: 3, kind: input, shape index: {}]   ;;  %s433_s4 = inlined_call_operand.hbm [shape: f32[8,128], index: 4, kind: output, shape index: {}]  }
   0x1   :  { %v284_v0 = vld [vmem:[%s431_s2 + $0x40] sm:$0xff]   ;;  %v286_v2 = vld [vmem:[%s431_s2 + $0x48] sm:$0xff]   ;;  %v288_v4 = vld [vmem:[%s431_s2 + $0x50] sm:$0xff]  }
   0x2   :  { %v285_v1 = vld [vmem:[%s431_s2] sm:$0xff]   ;;  %259 = vmatprep.subr.bf16.mxu0 %v284_v0  ;;  %v287_v3 = vld [vmem:[%s431_s2 + $0x8] sm:$0xff]   ;;  %v289_v5 = vld [vmem:[%s431_s2 + $0x10] sm:$0xff]  }
   0x3   :  { %260 = vmatpush3.bf16.msra.mxu0 %v285_v1  ;;  %v290_v6 = vld [vmem:[%s431_s2 + $0x58] sm:$0xff]   ;;  %v292_v8 = vld [vmem:[%s431_s2 + $0x60] sm:$0xff]   ;;  %v294_v10 = vld [vmem:[%s431_s2 + $0x68] sm:$0xff]  }
   0x4   :  { %261 = vmatprep.subr.bf16.mxu0 %v286_v2  ;;  %v291_v7 = vld [vmem:[%s431_s2 + $0x18] sm:$0xff]   ;;  %v293_v9 = vld [vmem:[%s431_s2 + $0x20] sm:$0xff]   ;;  %v21_v11 = vld [vmem:[%s430_s1 + $0x8] sm:$0xff] }
   0x7   :  { %262 = vmatpush3.bf16.msra.mxu0 %v287_v3 }
   0x8   :  { %263 = vmatprep.subr.bf16.mxu0 %v288_v4 }
   0xb   :  { %264 = vmatpush3.bf16.msra.mxu0 %v289_v5 }
   0xc   :  { %265 = vmatprep.subr.bf16.mxu0 %v290_v6 }
   0xf   :  { %266 = vmatpush3.bf16.msra.mxu0 %v291_v7 }
  0x10   :  { %267 = vmatprep.subr.bf16.mxu0 %v292_v8 }
  0x11   :  { %10 = vsyncpa [#allocation4], 0  ;;  %v23_v12 = vpack.c.bf16 %v21_v11, %v21_v11  ;;  %v295_v13 = vld [vmem:[%s431_s2 + $0x28] sm:$0xff]   ;;  %v296_v14 = vld [vmem:[%s431_s2 + $0x70] sm:$0xff]   ;;  %s328_s7 = smov [#allocation3]  }
  0x12   :  { %v297_v15 = vld [vmem:[%s431_s2 + $0x30] sm:$0xff]   ;;  %v298_v16 = vld [vmem:[%s431_s2 + $0x78] sm:$0xff]   ;;  %v20_v18 = vld [vmem:[%s430_s1] sm:$0xff] }
  0x13   :  { %268 = vmatpush3.bf16.msra.mxu0 %v293_v9  ;;  %189 = vmatprep.mubr.bf16.mxu0 %v23_v12  ;;  %v299_v17 = vld [vmem:[%s431_s2 + $0x38] sm:$0xff]   ;;  %v22_v19 = vpack.c.bf16 %v20_v18, %v20_v18  ;;  %v240_v21 = vld [vmem:[%s432_s3] ss:$0 sm:$0xff]  ;;  %v258_v31 = vld [vmem:[%s432_s3 + $0x1] ss:$0 sm:$0xff]  ;;  %s232_s3 = sshll.u32 %s328_s7, 4  ;;  %s233_s3 = int_to_ptr.vmem [resolvable:$true] %s232_s3 }
  0x14   :  { %269 = vmatprep.subr.bf16.mxu0 %v294_v10  ;;  %s304_s8 = scalar_lea.vmem %s233_s3, 128  ;;  %p309_p1 = scmp.lt.s32.totalorder %s233_s3, %s233_s3 }
  0x15   :  { %p305_p0 = scmp.ne.s32.totalorder %s233_s3, %s304_s8  ;;  %p310_p2 = scmp.lt.s32.totalorder %s304_s8, %s304_s8 }
  0x17   :  { %270 = vmatpush3.bf16.msra.mxu0 %v295_v13  ;;  %p311_p3 = por %p310_p2, %p309_p1 }
  0x18   :  { %271 = vmatprep.subr.bf16.mxu0 %v296_v14 }
  0x19   :  { %p312_p4 = pnand %p311_p3, %p305_p0 }
  0x1b   :  { %272 = vmatpush3.bf16.msra.mxu0 %v297_v15 }
  0x1c   :  { %273 = vmatprep.subr.bf16.mxu0 %v298_v16 }
  0x1f   :  { %274 = vmatpush3.bf16.msra.mxu0 %v299_v17 }
  0x22   :  { %190 = vmatmul.mubr.bf16.vlgmr.msra.gmra.mrb[0].mxu0 %v22_v19 }
  0xf5   :  { %v275_v20 = vpop.f32.mrb[0].mxu0 }
  0xf6   :  { %v276_v22 = vpop.f32.mrb[1].mxu0 }
  0xf7   :  { %v277_v23 = vadd.f32 %v276_v22, %v275_v20  ;;  %v278_v24 = vpop.f32.mrb[2].mxu0 }
  0xf8   :  { %v279_v25 = vpop.f32.mrb[3].mxu0 }
  0xf9   :  { %v192_v26 = vadd.f32 %v277_v23, %v240_v21 }
  0xfb   :  { %v257_v27 = vmul.f32 -1000.0, %v192_v26 }
  0xfd   :  { %v199_v28 = vmul.f32 1.442695, %v257_v27 }
  0xff   :  { %300 = vpow2.f32 %v199_v28 }
 0x109   :  { %v301_v29 = vpop.eup %300 }
 0x10a   :  { %v201_v30 = vadd.f32 1.0, %v301_v29 }
 0x10c   :  { %302 = vrcp.f32 %v201_v30 }
 0x116   :  { %v303_v32 = vpop.eup %302 }
 0x117   :  { %v209_v33 = vmul.f32 %v303_v32, %v258_v31 }
 0x119   :  { %210 = vadd.xlane.f32.xlu0 %v209_v33 }
 0x1a6   :  { %v211_v34 = vpop.xlane.xlu0 %210 }
 0x1a7   :  { %v212_v35 = vrot.slane %v211_v34, 4 }
 0x1a9   :  { %v213_v36 = vadd.f32 %v212_v35, %v211_v34 }
 0x1ab   :  { %v214_v37 = vrot.slane %v213_v36, 2 }
 0x1ad   :  { %v215_v38 = vadd.f32 %v214_v37, %v213_v36 }
 0x1af   :  { %v216_v39 = vrot.slane %v215_v38, 1 }
 0x1b1   :  { %v217_v40 = vadd.f32 %v216_v39, %v215_v38 }
 0x1b3   :  { %281 = vpush %v217_v40 }
 0x1e4   :  { %s282_s27 = spop %281 }
 0x1e5   :  { %s219_s28 = smul.f32 0.00390625, %s282_s27 }
 0x1e7   :  { %s221_s29 = sadd.f32 1.0, %s219_s28 }
 0x1e9   :  { %s222_s6 = ssub.f32 %s221_s29, %s429_s0 }
 0x1eb   :  { %v223_v41 = vstv %s222_s6 }
 0x1ec   :  { %v224_v42 = vmul.f32 %v223_v41, %v192_v26 }
 0x1ee   :  { %225 = vst [vmem:[#allocation3] sm:$0xff] %v224_v42 }
 0x1ef   :  { %315 = shalt.err (!%p312_p4)
}
 0x1f0   :  { %s316_s11 = scalar_lea.hbm %s433_s4, 128 }
 0x1f1   :  { %p317_p5 = scmp.ne.s32.totalorder %s433_s4, %s316_s11  ;;  %p320_p6 = scmp.lt.u32.totalorder %s316_s11, %s433_s4 }
 0x1f3   :  { %p322_p7 = pnand %p320_p6, %p317_p5 }
 0x1f5   :  { %325 = shalt.err (!%p322_p7)
}
 0x1f6   :  { %235 = dma.vmem_to_hbm [thread:$0]  %s233_s3, 128, %s433_s4, [#allocation4]  }
 0x1f7   :  { %326 = dma.done.wait [#allocation4], 128  }
 0x1f8   :  { %327 = vsyncadd [#allocation4], 4294967168 }
 0x1f9   :  { %239 = vsyncpa [#allocation4], 1 }

</bundles_post_ra>
